<compile_context>
chip_gen: v5e
topology: v5e:2x2
jax: 0.10.0
libtpu: 0.0.40
codegen_flags: <defaults>
</compile_context>

<pallas_src>
import numpy as np
import jax
import jax.numpy as jnp
from jax import lax
from jax.experimental import pallas as pl
from jax.experimental.pallas import tpu as pltpu


# ----------------------------- Pallas kernel -----------------------------

def _film_kernel(noise_ref, x_ref, pe_ref, w1_ref, b1_ref,
                 w2s_ref, b2s_ref, w2c_ref, b2c_ref,
                 shift_ref, scale_ref):
    """Per-batch FiLM forward, all in [C, T] (NCT) layout.

    noise_ref: [B]            SMEM, one scalar per batch element
    x_ref:     [1, Cin, T]    VMEM
    pe_ref:    [Cin, T]       positional encoding already divided by C=5000
    w1_ref:    [Cin, 3*Cin]   input_conv taps fused along K (k-major, ci-minor)
    b1_ref:    [Cin, 1]
    w2s_ref:   [Cout, 3*Cin]  output_conv taps, shift half
    b2s_ref:   [Cout, 1]
    w2c_ref:   [Cout, 3*Cin]  output_conv taps, scale half
    b2c_ref:   [Cout, 1]
    """
    b = pl.program_id(0)
    x = x_ref[0]                                   # [Cin, T]
    T = x.shape[1]

    def taps(v):
        # k=3, padding=1 conv taps: build [3*C, T] = [v(t-1); v(t); v(t+1)]
        # from an explicit zero-padded buffer (matches Conv1d zero padding).
        z = jnp.zeros((v.shape[0], 1), dtype=v.dtype)
        vp = jnp.concatenate([z, v, z], axis=1)    # [C, T+2]
        return jnp.concatenate(
            [vp[:, 0:T], vp[:, 1:T + 1], vp[:, 2:T + 2]], axis=0)

    # o = leaky_relu(input_conv(x), 0.2)   -- one fused-K MXU matmul
    o = jnp.dot(w1_ref[...], taps(x), preferred_element_type=jnp.float32)
    o = o + b1_ref[...]                            # [Cin, T] + [Cin, 1]
    o = jnp.where(o > 0, o, 0.2 * o)

    # o = o + noise_level[..., None, None] + pe / 5000
    o = o + noise_ref[b] + pe_ref[...]

    # shift, scale = chunk(output_conv(o), 2, dim=channels)
    # (weights pre-split -> direct lane-dense [Cout, T] writes, no slicing)
    ocat = taps(o)                                 # [3*Cin, T]
    shift_ref[0] = (jnp.dot(w2s_ref[...], ocat, preferred_element_type=jnp.float32)
                    + b2s_ref[...]).astype(shift_ref.dtype)
    scale_ref[0] = (jnp.dot(w2c_ref[...], ocat, preferred_element_type=jnp.float32)
                    + b2c_ref[...]).astype(scale_ref.dtype)


# ------------------------------ wrapper ----------------------------------

def film_forward(x, noise_scale, w1, b1, w2, b2):
    """x: [B, Cin, T] (PyTorch NCT), noise_scale: [B].
    Returns (shift, scale), each [B, Cout, T]."""
    B, Cin, T = x.shape
    Cout2 = w2.shape[0]
    Cout = Cout2 // 2

    x_f = x.astype(jnp.float32)                                  # [B, Cin, T], no transpose

    # Positional-encoding matrix (matches PositionalEncoding.init_pe_matrix),
    # built directly in the transposed [Cin, T] form PyTorch stores it in,
    # with the /C (=5000) division pre-applied.
    position = jnp.arange(T, dtype=jnp.float32)[:, None]                       # [T, 1]
    div_term = jnp.power(10000.0, jnp.arange(0, Cin, 2, dtype=jnp.float32) / Cin)
    pe = jnp.zeros((T, Cin), jnp.float32)
    pe = pe.at[:, 0::2].set(jnp.sin(position / div_term))
    pe = pe.at[:, 1::2].set(jnp.cos(position / div_term))
    pe_ct = jnp.transpose(pe) / 5000.0                                         # [Cin, T]

    # Fuse the three conv taps along K: w[out, in, k] -> [out, k*Cin + in].
    w1c = jnp.transpose(w1, (0, 2, 1)).reshape(Cin, 3 * Cin).astype(jnp.float32)
    w2c_full = jnp.transpose(w2, (0, 2, 1)).reshape(Cout2, 3 * Cin).astype(jnp.float32)
    w2_shift = w2c_full[:Cout]                                   # [Cout, 3*Cin]
    w2_scale = w2c_full[Cout:]                                   # [Cout, 3*Cin]

    b1r = b1.astype(jnp.float32)[:, None]                        # [Cin, 1]
    b2_shift = b2.astype(jnp.float32)[:Cout, None]               # [Cout, 1]
    b2_scale = b2.astype(jnp.float32)[Cout:, None]               # [Cout, 1]
    noise = noise_scale.astype(jnp.float32)                      # [B]

    grid_spec = pltpu.PrefetchScalarGridSpec(
        num_scalar_prefetch=0,
        grid=(B,),
        in_specs=[
            pl.BlockSpec(memory_space=pltpu.MemorySpace.SMEM),        # noise [B]
            pl.BlockSpec((1, Cin, T), lambda b: (b, 0, 0)),            # x
            pl.BlockSpec((Cin, T), lambda b: (0, 0)),                  # pe
            pl.BlockSpec((Cin, 3 * Cin), lambda b: (0, 0)),            # w1 fused
            pl.BlockSpec((Cin, 1), lambda b: (0, 0)),                  # b1
            pl.BlockSpec((Cout, 3 * Cin), lambda b: (0, 0)),           # w2 shift half
            pl.BlockSpec((Cout, 1), lambda b: (0, 0)),                 # b2 shift half
            pl.BlockSpec((Cout, 3 * Cin), lambda b: (0, 0)),           # w2 scale half
            pl.BlockSpec((Cout, 1), lambda b: (0, 0)),                 # b2 scale half
        ],
        out_specs=[
            pl.BlockSpec((1, Cout, T), lambda b: (b, 0, 0)),
            pl.BlockSpec((1, Cout, T), lambda b: (b, 0, 0)),
        ],
    )

    flops = 2 * B * T * 3 * Cin * (Cin + 2 * Cout)
    bytes_accessed = 4 * (B * Cin * T + 2 * B * Cout * T + Cin * T
                          + 3 * Cin * Cin + 3 * Cin * Cout2 + Cin + Cout2 + B)

    shift, scale = pl.pallas_call(
        _film_kernel,
        out_shape=(jax.ShapeDtypeStruct((B, Cout, T), jnp.float32),
                   jax.ShapeDtypeStruct((B, Cout, T), jnp.float32)),
        grid_spec=grid_spec,
        compiler_params=pltpu.CompilerParams(
            dimension_semantics=("parallel",),
            vmem_limit_bytes=48 * 1024 * 1024),
        cost_estimate=pl.CostEstimate(flops=int(flops), transcendentals=0,
                                      bytes_accessed=int(bytes_accessed)),
    )(noise, x_f, pe_ct, w1c, b1r, w2_shift, b2_shift, w2_scale, b2_scale)

    # Already in PyTorch convention [B, Cout, T]; no output transposes needed.
    return shift, scale


# --------------------------- pure-JAX reference ---------------------------

def _ref_forward(x, noise_scale, w1, b1, w2, b2):
    def conv1d(inp, w, b):
        out = lax.conv_general_dilated(inp, w, window_strides=(1,),
                                       padding=((1, 1),),
                                       dimension_numbers=('NCH', 'OIH', 'NCH'))
        return out + b[None, :, None]

    o = conv1d(x, w1, b1)
    o = jnp.where(o > 0, o, 0.2 * o)
    B, C, T = o.shape
    position = jnp.arange(T, dtype=jnp.float32)[:, None]
    div_term = jnp.power(10000.0, jnp.arange(0, C, 2, dtype=jnp.float32) / C)
    pe = jnp.zeros((T, C), jnp.float32)
    pe = pe.at[:, 0::2].set(jnp.sin(position / div_term))
    pe = pe.at[:, 1::2].set(jnp.cos(position / div_term))
    o = o + noise_scale[:, None, None] + pe.T[None] / 5000.0
    out = conv1d(o, w2, b2)
    half = out.shape[1] // 2
    return out[:, :half], out[:, half:]


# ----------------------------- parameter init -----------------------------

def _xavier_uniform(key, shape):
    # shape = [out_ch, in_ch, kernel] -> fan_in = in*k, fan_out = out*k
    fan_in = shape[1] * shape[2]
    fan_out = shape[0] * shape[2]
    a = float(np.sqrt(6.0 / (fan_in + fan_out)))
    return jax.random.uniform(key, shape, jnp.float32, -a, a)


if __name__ == "__main__":
    B, input_size, output_size, T = 2, 8, 4, 64

    key = jax.random.PRNGKey(0)
    k_x, k_noise, k_w1, k_w2 = jax.random.split(key, 4)

    x = jax.random.normal(k_x, (B, input_size, T), jnp.float32)
    noise_scale = jax.random.normal(k_noise, (B,), jnp.float32)

    w1 = _xavier_uniform(k_w1, (input_size, input_size, 3))
    b1 = jnp.zeros((input_size,), jnp.float32)
    w2 = _xavier_uniform(k_w2, (output_size * 2, input_size, 3))
    b2 = jnp.zeros((output_size * 2,), jnp.float32)

    shift, scale = film_forward(x, noise_scale, w1, b1, w2, b2)
    jax.block_until_ready((shift, scale))

    shift_ref, scale_ref = _ref_forward(x, noise_scale, w1, b1, w2, b2)
    np.testing.assert_allclose(np.asarray(shift), np.asarray(shift_ref),
                               rtol=1e-4, atol=1e-4)
    np.testing.assert_allclose(np.asarray(scale), np.asarray(scale_ref),
                               rtol=1e-4, atol=1e-4)
    assert shift.shape == (B, output_size, T) and scale.shape == (B, output_size, T)

    print("KERNEL_OK")
</pallas_src>

<mosaic_0001>
module attributes {stable_mosaic.version = 11 : i64} {
  func.func @_film_kernel(%arg0: i32, %arg1: memref<2xf32, #tpu.memory_space<smem>>, %arg2: memref<1x8x64xf32, #tpu.memory_space<vmem>>, %arg3: memref<8x64xf32, #tpu.memory_space<vmem>>, %arg4: memref<8x24xf32, #tpu.memory_space<vmem>>, %arg5: memref<8x1xf32, #tpu.memory_space<vmem>>, %arg6: memref<4x24xf32, #tpu.memory_space<vmem>>, %arg7: memref<4x1xf32, #tpu.memory_space<vmem>>, %arg8: memref<4x24xf32, #tpu.memory_space<vmem>>, %arg9: memref<4x1xf32, #tpu.memory_space<vmem>>, %arg10: memref<1x4x64xf32, #tpu.memory_space<vmem>>, %arg11: memref<1x4x64xf32, #tpu.memory_space<vmem>>) attributes {dimension_semantics = [#tpu.dimension_semantics<parallel>], iteration_bounds = array<i64: 2>, scalar_prefetch = 0 : i64, scratch_operands = 0 : i64, tpu.core_type = #tpu.core_type<tc>, window_params = [{transform_indices = @transform_0, window_bounds = array<i64: 2>}, {transform_indices = @transform_1, window_bounds = array<i64: 1, 8, 64>}, {pipeline_mode = #tpu.pipeline_mode<synchronous>, transform_indices = @transform_2, window_bounds = array<i64: 8, 64>}, {pipeline_mode = #tpu.pipeline_mode<synchronous>, transform_indices = @transform_3, window_bounds = array<i64: 8, 24>}, {pipeline_mode = #tpu.pipeline_mode<synchronous>, transform_indices = @transform_4, window_bounds = array<i64: 8, 1>}, {pipeline_mode = #tpu.pipeline_mode<synchronous>, transform_indices = @transform_5, window_bounds = array<i64: 4, 24>}, {pipeline_mode = #tpu.pipeline_mode<synchronous>, transform_indices = @transform_6, window_bounds = array<i64: 4, 1>}, {pipeline_mode = #tpu.pipeline_mode<synchronous>, transform_indices = @transform_7, window_bounds = array<i64: 4, 24>}, {pipeline_mode = #tpu.pipeline_mode<synchronous>, transform_indices = @transform_8, window_bounds = array<i64: 4, 1>}, {transform_indices = @transform_9, window_bounds = array<i64: 1, 4, 64>}, {transform_indices = @transform_10, window_bounds = array<i64: 1, 4, 64>}]} {
    %c0 = arith.constant 0 : index
    %c0_0 = arith.constant 0 : index
    %c0_1 = arith.constant 0 : index
    %0 = vector.load %arg2[%c0, %c0_0, %c0_1] : memref<1x8x64xf32, #tpu.memory_space<vmem>>, vector<1x8x64xf32>
    %1 = vector.shape_cast %0 : vector<1x8x64xf32> to vector<8x64xf32>
    %c0_2 = arith.constant 0 : index
    %c0_3 = arith.constant 0 : index
    %2 = vector.load %arg4[%c0_2, %c0_3] : memref<8x24xf32, #tpu.memory_space<vmem>>, vector<8x24xf32>
    %cst = arith.constant 0.000000e+00 : f32
    %3 = vector.broadcast %cst : f32 to vector<8x1xf32>
    %4 = tpu.concatenate %3, %1, %3 in 1 : vector<8x1xf32>, vector<8x64xf32>, vector<8x1xf32> -> vector<8x66xf32>
    %5 = vector.extract_strided_slice %4 {offsets = [0, 0], sizes = [8, 64], strides = [1, 1]} : vector<8x66xf32> to vector<8x64xf32>
    %6 = vector.extract_strided_slice %4 {offsets = [0, 1], sizes = [8, 64], strides = [1, 1]} : vector<8x66xf32> to vector<8x64xf32>
    %7 = vector.extract_strided_slice %4 {offsets = [0, 2], sizes = [8, 64], strides = [1, 1]} : vector<8x66xf32> to vector<8x64xf32>
    %8 = tpu.concatenate %5, %6, %7 in 0 : vector<8x64xf32>, vector<8x64xf32>, vector<8x64xf32> -> vector<24x64xf32>
    %cst_4 = arith.constant dense<0.000000e+00> : vector<8x64xf32>
    %9 = tpu.matmul %2, %8, %cst_4 {dimension_numbers = #tpu.dot_dimension_numbers<[1], [0], [0], [1], [0, 0, 1, 1], [], []>} : vector<8x24xf32>, vector<24x64xf32>, vector<8x64xf32> -> vector<8x64xf32>
    %c0_5 = arith.constant 0 : index
    %c0_6 = arith.constant 0 : index
    %10 = vector.load %arg5[%c0_5, %c0_6] : memref<8x1xf32, #tpu.memory_space<vmem>>, vector<8x1xf32>
    %11 = vector.broadcast %10 : vector<8x1xf32> to vector<8x64xf32>
    %12 = arith.addf %9, %11 : vector<8x64xf32>
    %cst_7 = arith.constant 0.000000e+00 : f32
    %13 = vector.broadcast %cst_7 : f32 to vector<8x64xf32>
    %14 = arith.cmpf ogt, %12, %13 : vector<8x64xf32>
    %cst_8 = arith.constant 2.000000e-01 : f32
    %15 = vector.broadcast %cst_8 : f32 to vector<8x64xf32>
    %16 = arith.mulf %15, %12 : vector<8x64xf32>
    %17 = arith.select %14, %12, %16 : vector<8x64xi1>, vector<8x64xf32>
    %18 = arith.index_cast %arg0 : i32 to index
    %19 = memref.load %arg1[%18] : memref<2xf32, #tpu.memory_space<smem>>
    %20 = vector.broadcast %19 : f32 to vector<8x64xf32>
    %21 = arith.addf %17, %20 : vector<8x64xf32>
    %c0_9 = arith.constant 0 : index
    %c0_10 = arith.constant 0 : index
    %22 = vector.load %arg3[%c0_9, %c0_10] : memref<8x64xf32, #tpu.memory_space<vmem>>, vector<8x64xf32>
    %23 = arith.addf %21, %22 : vector<8x64xf32>
    %cst_11 = arith.constant 0.000000e+00 : f32
    %24 = vector.broadcast %cst_11 : f32 to vector<8x1xf32>
    %25 = tpu.concatenate %24, %23, %24 in 1 : vector<8x1xf32>, vector<8x64xf32>, vector<8x1xf32> -> vector<8x66xf32>
    %26 = vector.extract_strided_slice %25 {offsets = [0, 0], sizes = [8, 64], strides = [1, 1]} : vector<8x66xf32> to vector<8x64xf32>
    %27 = vector.extract_strided_slice %25 {offsets = [0, 1], sizes = [8, 64], strides = [1, 1]} : vector<8x66xf32> to vector<8x64xf32>
    %28 = vector.extract_strided_slice %25 {offsets = [0, 2], sizes = [8, 64], strides = [1, 1]} : vector<8x66xf32> to vector<8x64xf32>
    %29 = tpu.concatenate %26, %27, %28 in 0 : vector<8x64xf32>, vector<8x64xf32>, vector<8x64xf32> -> vector<24x64xf32>
    %c0_12 = arith.constant 0 : index
    %c0_13 = arith.constant 0 : index
    %30 = vector.load %arg6[%c0_12, %c0_13] : memref<4x24xf32, #tpu.memory_space<vmem>>, vector<4x24xf32>
    %cst_14 = arith.constant dense<0.000000e+00> : vector<4x64xf32>
    %31 = tpu.matmul %30, %29, %cst_14 {dimension_numbers = #tpu.dot_dimension_numbers<[1], [0], [0], [1], [0, 0, 1, 1], [], []>} : vector<4x24xf32>, vector<24x64xf32>, vector<4x64xf32> -> vector<4x64xf32>
    %c0_15 = arith.constant 0 : index
    %c0_16 = arith.constant 0 : index
    %32 = vector.load %arg7[%c0_15, %c0_16] : memref<4x1xf32, #tpu.memory_space<vmem>>, vector<4x1xf32>
    %33 = vector.broadcast %32 : vector<4x1xf32> to vector<4x64xf32>
    %34 = arith.addf %31, %33 : vector<4x64xf32>
    %c0_17 = arith.constant 0 : index
    %c0_18 = arith.constant 0 : index
    %c0_19 = arith.constant 0 : index
    %35 = vector.load %arg10[%c0_17, %c0_18, %c0_19] : memref<1x4x64xf32, #tpu.memory_space<vmem>>, vector<1x4x64xf32>
    %36 = vector.shape_cast %35 : vector<1x4x64xf32> to vector<4x64xf32>
    %37 = vector.shape_cast %34 : vector<4x64xf32> to vector<1x4x64xf32>
    tpu.vector_store %arg10[%c0_17, %c0_18, %c0_19], %37 {strides = array<i32>} : memref<1x4x64xf32, #tpu.memory_space<vmem>>, vector<1x4x64xf32>,
    %c0_20 = arith.constant 0 : index
    %c0_21 = arith.constant 0 : index
    %38 = vector.load %arg8[%c0_20, %c0_21] : memref<4x24xf32, #tpu.memory_space<vmem>>, vector<4x24xf32>
    %cst_22 = arith.constant dense<0.000000e+00> : vector<4x64xf32>
    %39 = tpu.matmul %38, %29, %cst_22 {dimension_numbers = #tpu.dot_dimension_numbers<[1], [0], [0], [1], [0, 0, 1, 1], [], []>} : vector<4x24xf32>, vector<24x64xf32>, vector<4x64xf32> -> vector<4x64xf32>
    %c0_23 = arith.constant 0 : index
    %c0_24 = arith.constant 0 : index
    %40 = vector.load %arg9[%c0_23, %c0_24] : memref<4x1xf32, #tpu.memory_space<vmem>>, vector<4x1xf32>
    %41 = vector.broadcast %40 : vector<4x1xf32> to vector<4x64xf32>
    %42 = arith.addf %39, %41 : vector<4x64xf32>
    %c0_25 = arith.constant 0 : index
    %c0_26 = arith.constant 0 : index
    %c0_27 = arith.constant 0 : index
    %43 = vector.load %arg11[%c0_25, %c0_26, %c0_27] : memref<1x4x64xf32, #tpu.memory_space<vmem>>, vector<1x4x64xf32>
    %44 = vector.shape_cast %43 : vector<1x4x64xf32> to vector<4x64xf32>
    %45 = vector.shape_cast %42 : vector<4x64xf32> to vector<1x4x64xf32>
    tpu.vector_store %arg11[%c0_25, %c0_26, %c0_27], %45 {strides = array<i32>} : memref<1x4x64xf32, #tpu.memory_space<vmem>>, vector<1x4x64xf32>,
    return
  }
  func.func @transform_0(%arg0: i32) -> i32 {
    %c0_i32 = arith.constant 0 : i32
    %c0_i32_0 = arith.constant 0 : i32
    return %c0_i32 : i32
  }
  func.func @transform_1(%arg0: i32) -> (i32, i32, i32) {
    %c0_i32 = arith.constant 0 : i32
    %c0_i32_0 = arith.constant 0 : i32
    %c0_i32_1 = arith.constant 0 : i32
    return %arg0, %c0_i32, %c0_i32_0 : i32, i32, i32
  }
  func.func @transform_2(%arg0: i32) -> (i32, i32) {
    %c0_i32 = arith.constant 0 : i32
    %c0_i32_0 = arith.constant 0 : i32
    %c0_i32_1 = arith.constant 0 : i32
    return %c0_i32, %c0_i32_0 : i32, i32
  }
  func.func @transform_3(%arg0: i32) -> (i32, i32) {
    %c0_i32 = arith.constant 0 : i32
    %c0_i32_0 = arith.constant 0 : i32
    %c0_i32_1 = arith.constant 0 : i32
    return %c0_i32, %c0_i32_0 : i32, i32
  }
  func.func @transform_4(%arg0: i32) -> (i32, i32) {
    %c0_i32 = arith.constant 0 : i32
    %c0_i32_0 = arith.constant 0 : i32
    %c0_i32_1 = arith.constant 0 : i32
    return %c0_i32, %c0_i32_0 : i32, i32
  }
  func.func @transform_5(%arg0: i32) -> (i32, i32) {
    %c0_i32 = arith.constant 0 : i32
    %c0_i32_0 = arith.constant 0 : i32
    %c0_i32_1 = arith.constant 0 : i32
    return %c0_i32, %c0_i32_0 : i32, i32
  }
  func.func @transform_6(%arg0: i32) -> (i32, i32) {
    %c0_i32 = arith.constant 0 : i32
    %c0_i32_0 = arith.constant 0 : i32
    %c0_i32_1 = arith.constant 0 : i32
    return %c0_i32, %c0_i32_0 : i32, i32
  }
  func.func @transform_7(%arg0: i32) -> (i32, i32) {
    %c0_i32 = arith.constant 0 : i32
    %c0_i32_0 = arith.constant 0 : i32
    %c0_i32_1 = arith.constant 0 : i32
    return %c0_i32, %c0_i32_0 : i32, i32
  }
  func.func @transform_8(%arg0: i32) -> (i32, i32) {
    %c0_i32 = arith.constant 0 : i32
    %c0_i32_0 = arith.constant 0 : i32
    %c0_i32_1 = arith.constant 0 : i32
    return %c0_i32, %c0_i32_0 : i32, i32
  }
  func.func @transform_9(%arg0: i32) -> (i32, i32, i32) {
    %c0_i32 = arith.constant 0 : i32
    %c0_i32_0 = arith.constant 0 : i32
    %c0_i32_1 = arith.constant 0 : i32
    return %arg0, %c0_i32, %c0_i32_0 : i32, i32, i32
  }
  func.func @transform_10(%arg0: i32) -> (i32, i32, i32) {
    %c0_i32 = arith.constant 0 : i32
    %c0_i32_0 = arith.constant 0 : i32
    %c0_i32_1 = arith.constant 0 : i32
    return %arg0, %c0_i32, %c0_i32_0 : i32, i32, i32
  }
}

</mosaic_0001>

<bundles_post_ra>
// kernel: tpu_custom_call.1
= control target key start
LH: loop header
LB: loop body
LE: loop exit
PB: predicated region body
PF: predicated region fallthrough
CT: control target
= control target key end

     0   :  { %s1223_s0 = inlined_call_operand.hbm [shape: f32[2], index: 0, kind: input, shape index: {}]   ;;  %s1224_s1 = inlined_call_operand.vmem [shape: f32[2,8,64], index: 1, kind: input, shape index: {}]   ;;  %s1225_s2 = inlined_call_operand.hbm [shape: f32[8,64], index: 2, kind: input, shape index: {}]   ;;  %s1226_s3 = inlined_call_operand.hbm [shape: f32[8,24], index: 3, kind: input, shape index: {}]   ;;  %s1227_s4 = inlined_call_operand.vmem [shape: f32[8,1], index: 4, kind: input, shape index: {}]   ;;  %s1228_s5 = inlined_call_operand.vmem [shape: f32[4,24], index: 5, kind: input, shape index: {}]   ;;  %s1229_s6 = inlined_call_operand.vmem [shape: f32[4,1], index: 6, kind: input, shape index: {}]   ;;  %s1230_s7 = inlined_call_operand.vmem [shape: f32[4,24], index: 7, kind: input, shape index: {}]   ;;  %s1231_s8 = inlined_call_operand.vmem [shape: f32[4,1], index: 8, kind: input, shape index: {}]   ;;  %s1232_s9 = inlined_call_operand.hbm [shape: f32[2,4,64], index: 9, kind: output, shape index: {0}]   ;;  %s1233_s10 = inlined_call_operand.hbm [shape: f32[2,4,64], index: 10, kind: output, shape index: {1}]  }
   0x1   :  { %1234 = sst [smem:[#allocation18_spill]] %s1223_s0 }
   0x2   :  { %1235 = sst [smem:[#allocation19_spill]] %s1224_s1 }
   0x3   :  { %1236 = sst [smem:[#allocation20_spill]] %s1225_s2 }
   0x4   :  { %1237 = sst [smem:[#allocation21_spill]] %s1226_s3 }
   0x5   :  { %16 = vsyncpa [#allocation5], 0 }
   0x6   :  { %17 = vsyncpa [#allocation3], 0 }
   0x7   :  { %18 = vsyncpa [#allocation8], 0 }
   0x8   :  { %19 = vsyncpa [#allocation4], 0 }
   0x9   :  { %21 = vsyncpa [#allocation4 + $0x1], 0 }
   0xa   :  { %22 = vsyncpa [#allocation11], 0 }
   0xb   :  { %24 = vsyncpa [#allocation11 + $0x1], 0  ;;  %s1054_s13 = smov 0   ;;  %s1056_s14 = smov 0  }
   0xc   :  { %s1058_s15 = smov 0   ;;  %s1060_s16 = smov 0  }
   0xd LB: > { %s1075_s17 = sadd.s32 4294967295, %s990_s16   ;;  %s702_s18 = sadd.s32 4294967294, %s990_s16   ;;  %s990_s16 = sphi %s1060_s16, %s1250_s16   ;;  %s986_s15 = sphi %s1058_s15, %s1249_s15   ;;  %s982_s14 = sphi %s1056_s14, %s1248_s14   ;;  %s978_s13 = sphi %s1054_s13, %s1247_s13  }
   0xe   : > { %s1079_s19 = sadd.s32 1, %s990_s16   ;;  %s231_s20 = sadd.s32 1, %s986_s15 }
   0xf   : > { %s228_s21 = ssub.s32 %s990_s16, %s1079_s19  ;;  %p241_p0 = scmp.ne.s32.totalorder %s986_s15, %s982_s14 }
  0x10   : > { %p229_p1 = scmp.eq.s32.totalorder %s228_s21, 0  ;;  %p242_p2 = scmp.eq.s32.totalorder %s1075_s17, 1 }
  0x11   : > { %p247_p3 = scmp.ne.s32.totalorder %s982_s14, %s978_s13  ;;  %p248_p4 = scmp.eq.s32.totalorder %s702_s18, 1 }
  0x12   : > { %s1090_s22 = scalar_select %p229_p1, %s986_s15, %s231_s20  }
  0x13   : > { %p1092_p5 = por %p242_p2, %p241_p0  ;;  %p1096_p6 = por %p248_p4, %p247_p3 }
  0x14   : > { %1238 = sst [smem:[#allocation17_spill]] %s1090_s22  ;;  %p703_p7 = scmp.ge.s32.totalorder %s990_s16, 1 }
  0x15   : > { %p281_p8 = scmp.lt.s32.totalorder %s990_s16, 3  ;;  %p760_p9 = scmp.eq.s32.totalorder %s1075_s17, 0 }
  0x16   : > { %s1242_s0 = sld [smem:[#allocation18_spill]]  ;;  %s992_s12 = smov [#allocation6]  }
  0x17   : > { %p1103_p10 = pnand %p703_p7, %p281_p8  ;;  %s1243_s2 = sld [smem:[#allocation20_spill]] }
  0x18   : > { %s305_s18 = sshll.u32 %s992_s12, 4  ;;  %s1244_s3 = sld [smem:[#allocation21_spill]]  ;;  %s306_s18 = int_to_ptr.vmem [resolvable:$true] %s305_s18 }
  0x19   : > { %p743_p11 = pneg %p1103_p10  ;;  %s993_s26 = smov [#allocation2]  }
  0x1a   : > { %s994_s27 = smov [#allocation7]  }
  0x1b   : > { %p744_p12 = pnand %p760_p9, %p743_p11 }
  0x1c   : > { %s293_s28 = sshll.u32 %s1242_s0, 4  ;;  %s317_s0 = sshll.u32 %s994_s27, 4  ;;  %s294_s28 = int_to_ptr.hbm [resolvable:$true] %s293_s28  ;;  %s318_s0 = int_to_ptr.vmem [resolvable:$true] %s317_s0 }
  0x1d   : > { %s303_s11 = sshll.u32 %s1243_s2, 4  ;;  %352 = sbr.rel (%p1103_p10) target bundleno = 775 (0x307), region = 56  ;;  %s304_s11 = int_to_ptr.hbm [resolvable:$true] %s303_s11 }
  0x1e   : > { %s315_s22 = sshll.u32 %s1244_s3, 4  ;;  %s316_s22 = int_to_ptr.hbm [resolvable:$true] %s315_s22 }
  0x1f   : > { %746 = dma.hbm_to_smem (!%p744_p12), %s294_s28, 16, %s993_s26, [#allocation5]  }
  0x20   : > { %749 = dma.hbm_to_vmem [thread:$0]  (!%p744_p12), %s304_s11, 128, %s306_s18, [#allocation3]  }
  0x21   : > { %752 = dma.hbm_to_vmem [thread:$0]  (!%p744_p12), %s316_s22, 128, %s318_s0, [#allocation8]  }
  0x22   : > { %957 = dma.done.wait (%p760_p9), [#allocation5], 16  }
  0x23   : > { %959 = vsyncadd (%p760_p9), [#allocation5], 4294967280 }
  0x24   : > { %961 = dma.done.wait (%p760_p9), [#allocation3], 128  }
  0x25   : > { %963 = vsyncadd (%p760_p9), [#allocation3], 4294967168 }
  0x26   : > { %965 = dma.done.wait (%p760_p9), [#allocation8], 128  }
  0x27   : > { %967 = vsyncadd (%p760_p9), [#allocation8], 4294967168 }
  0x28   : > { %369 = sfence }
  0x29   : > { %p406_p13 = scmp.lt.s32.totalorder %s1075_s17, 1  ;;  %s1245_s1 = sld [smem:[#allocation19_spill]]  ;;  %vm416_vm0 = vcmask 7168   ;;  %vm418_vm1 = vcmask 531456   ;;  %v427_v4 = vld [vmem:[%s1227_s4] sm:$0xff]  ;;  %v998_v5 = vmov 0  }
  0x2a   : > { %s995_s30 = smov 1   ;;  %s996_s11 = smov 127   ;;  %806 = vset.pattern.permute.xlu1 %v998_v5  ;;  %807 = vset.pattern.permute.xlu2 %v998_v5  ;;  %v479_v6 = vld [vmem:[%s1229_s6] sm:$0xf]  ;;  %v411_v9 = vld [vmem:[#allocation7] sm:$0xff]  ;;  %vm433_vm2 = vcmask 195584  }
  0x2b   : > { %s407_s0 = scalar_select %p406_p13, %s1075_s17, 1  ;;  %808 = vset.pattern.permute.xlu0 %v998_v5  ;;  %v463_v16 = vld [vmem:[#allocation6] sm:$0xff]  ;;  %vm508_vm4 = vcmask 519168  }
  0x2c   : > { %s997_s12 = smov 126   ;;  %s460_s27 = sld [smem:[#allocation2 + %s1075_s17]]  ;;  %v511_v22 = vld [vmem:[%s1231_s8] sm:$0xf] }
  0x2d   : > { %s714_s22 = sshll.u32 %s407_s0, 3  ;;  %v478_v25 = vld [vmem:[%s1228_s5] sm:$0xf] }
  0x2e   : > { %v510_v26 = vld [vmem:[%s1230_s7] sm:$0xf] }
  0x2f   : > { %s409_s29 = scalar_lea.vmem %s1245_s1, %s714_s22 }
  0x30   : > { %v410_v0 = vld [vmem:[%s409_s29] sm:$0xff] }
  0x31   : > { %413 = vrot.lane.b32.xlu0 %v410_v0, %s995_s30 }
  0x32   : > { %v461_v14 = vstv %s460_s27 }
  0xa3   : > { %v414_v1 = vpop.permute.xlu0 %413 }
  0xa4   : > { %v417_v2 = vsel %vm416_vm0, 0.0, %v414_v1 }
  0xa5   : > { %v419_v3 = vsel %vm418_vm1, %v417_v2, 0.0 }
  0xa6   : > { %421 = vrot.lane.b32.xlu1 %v419_v3, %s996_s11  ;;  %424 = vrot.lane.b32.xlu0 %v419_v3, %s997_s12 }
  0xae   : > { %430 = vperm.xlu1 %806, %v427_v4  }
  0xb6   : > { %482 = vperm.xlu1 %806, %v479_v6  }
 0x118   : > { %v425_v7 = vpop.permute.xlu0 %424  ;;  %v422_v8 = vpop.permute.xlu1 %421 }
 0x119   : > { %450 = vmatpush.msra.mxu0 %v425_v7 }
 0x11b   : > { %451 = vmatpush.msra.mxu0 %v422_v8 }
 0x11d   : > { %715 = vmatpush.msk.msra.mxu0 %vm418_vm1, %v417_v2 }
 0x11e   : > { %716 = vmatmul.msk.f32.vlgmr.msra.gmra.mxu0 %vm433_vm2, %v411_v9 }
 0x120   : > { %v431_v10 = vpop.permute.xlu1 %430 }
 0x128   : > { %v483_v27 = vpop.permute.xlu1 %482 }
 0x19b   : > { %v454_v11 = vpop.f32.mrf.mxu0 }
 0x19c   : > { %v455_v12 = vadd.f32 %v454_v11, %v431_v10 }
 0x19e   : > { %vm457_vm3 = vcmp.gt.f32.partialorder %v455_v12, 0.0  ;;  %v458_v13 = vmul.f32 0.2, %v455_v12 }
 0x1a0   : > { %v459_v15 = vsel %vm457_vm3, %v455_v12, %v458_v13 }
 0x1a1   : > { %v462_v17 = vadd.f32 %v461_v14, %v459_v15 }
 0x1a3   : > { %v464_v18 = vadd.f32 %v463_v16, %v462_v17 }
 0x1a5   : > { %466 = vrot.lane.b32.xlu2 %v464_v18, %s995_s30 }
 0x1ff   : > { %v467_v19 = vpop.permute.xlu2 %466 }
 0x200   : > { %v469_v20 = vsel %vm416_vm0, 0.0, %v467_v19 }
 0x201   : > { %v470_v21 = vsel %vm418_vm1, %v469_v20, 0.0 }
 0x202   : > { %472 = vrot.lane.b32.xlu0 %v470_v21, %s996_s11  ;;  %475 = vrot.lane.b32.xlu2 %v470_v21, %s997_s12  ;;  %s1172_s11 = sand.u32 1, %s982_s14   ;;  %s723_s12 = sshll.u32 %s1075_s17, 2 }
 0x203   : > { %s712_s18 = sshll.u32 %s1172_s11, 2  ;;  %s557_s26 = scalar_lea.hbm %s1232_s9, %s723_s12 }
 0x204   : > { %s398_s27 = scalar_lea.vmem [#allocation9], %s712_s18  ;;  %s561_s22 = sshll.u32 %s557_s26, 4  ;;  %s562_s22 = int_to_ptr.hbm [resolvable:$true] %s561_s22 }
 0x205   : > { %s559_s0 = sshll.u32 %s398_s27, 4  ;;  %s571_s29 = scalar_lea.hbm %s1233_s10, %s723_s12  ;;  %s560_s0 = int_to_ptr.vmem [resolvable:$true] %s559_s0 }
 0x206   : > { %s405_s17 = scalar_lea.vmem [#allocation10], %s712_s18  ;;  %s575_s20 = sshll.u32 %s571_s29, 4  ;;  %s576_s20 = int_to_ptr.hbm [resolvable:$true] %s575_s20 }
 0x207   : > { %s573_s30 = sshll.u32 %s405_s17, 4  ;;  %s542_s21 = scalar_lea.sflag [#allocation4], %s1172_s11  ;;  %s574_s30 = int_to_ptr.vmem [resolvable:$true] %s573_s30 }
 0x208   : > { %s898_s1 = sshra.s32 %s562_s22, 4  ;;  %s904_s12 = scalar_lea.hbm %s1232_s9, 8  ;;  %s899_s1 = int_to_ptr.hbm [resolvable:$true] %s898_s1 }
 0x209   : > { %s900_s26 = scalar_lea.hbm %s899_s1, 4  ;;  %p905_p3 = scmp.lt.s32.totalorder %s899_s1, %s1232_s9 }
 0x20a   : > { %514 = vperm.xlu2 %807, %v511_v22   ;;  %p901_p0 = scmp.ne.s32.totalorder %s899_s1, %s900_s26  ;;  %p906_p4 = scmp.lt.s32.totalorder %s904_s12, %s900_s26 }
 0x20c   : > { %p902_p1 = pnand %p901_p0, %p1092_p5  ;;  %p907_p7 = por %p906_p4, %p905_p3 }
 0x20e   : > { %p903_p2 = pneg %p902_p1 }
 0x210   : > { %p908_p8 = pnand %p907_p7, %p903_p2 }
 0x25c   : > { %v476_v23 = vpop.permute.xlu2 %475 }
 0x25d   : > { %501 = vmatpush.msra.mxu1 %v476_v23  ;;  %533 = vmatpush.msra.mxu2 %v476_v23 }
 0x264   : > { %v515_v30 = vpop.permute.xlu2 %514 }
 0x274   : > { %v473_v24 = vpop.permute.xlu0 %472 }
 0x275   : > { %502 = vmatpush.msra.mxu1 %v473_v24  ;;  %534 = vmatpush.msra.mxu2 %v473_v24 }
 0x277   : > { %717 = vmatpush.msk.msra.mxu1 %vm418_vm1, %v469_v20  ;;  %719 = vmatpush.msk.msra.mxu2 %vm418_vm1, %v469_v20 }
 0x278   : > { %718 = vmatmul.msk.f32.vlgmr.msra.gmra.mxu1 %vm433_vm2, %v478_v25  ;;  %720 = vmatmul.msk.f32.vlgmr.msra.gmra.mxu2 %vm433_vm2, %v510_v26 }
 0x2f5   : > { %v505_v28 = vpop.f32.mrf.mxu1 }
 0x2f6   : > { %v506_v29 = vadd.f32 %v505_v28, %v483_v27 }
 0x2f8   : > { %509 = vst.msk [vmem:[%s398_s27] sm:$0xf] %vm508_vm4, %v506_v29 }
 0x2f9   : > { %911 = shalt.err (!%p908_p8)
}
 0x2fa   : > { %739 = dma.vmem_to_hbm [thread:$0]  (%p1092_p5), %s560_s0, 64, %s562_s22, %s542_s21  }
 0x2fb   : > { %v537_v31 = vpop.f32.mrf.mxu2  ;;  %s547_s2 = scalar_lea.sflag [#allocation11], %s1172_s11  ;;  %s926_s18 = sshra.s32 %s576_s20, 4  ;;  %s927_s18 = int_to_ptr.hbm [resolvable:$true] %s926_s18 }
 0x2fc   : > { %v538_v32 = vadd.f32 %v537_v31, %v515_v30  ;;  %s928_s3 = scalar_lea.hbm %s927_s18, 4  ;;  %s932_s29 = scalar_lea.hbm %s1233_s10, 8 }
 0x2fd   : > { %p929_p9 = scmp.ne.s32.totalorder %s927_s18, %s928_s3  ;;  %p933_p12 = scmp.lt.s32.totalorder %s927_s18, %s1233_s10 }
 0x2fe   : > { %540 = vst.msk [vmem:[%s405_s17] sm:$0xf] %vm508_vm4, %v538_v32  ;;  %p934_p13 = scmp.lt.s32.totalorder %s932_s29, %s928_s3 }
 0x2ff   : > { %p930_p10 = pnand %p929_p9, %p1092_p5 }
 0x300   : > { %p935_p0 = por %p934_p13, %p933_p12 }
 0x301   : > { %p931_p11 = pneg %p930_p10 }
 0x303   : > { %p936_p1 = pnand %p935_p0, %p931_p11 }
 0x305   : > { %939 = shalt.err (!%p936_p1)
}
 0x306   : > { %740 = dma.vmem_to_hbm [thread:$0]  (%p1092_p5), %s574_s30, 64, %s576_s20, %s547_s2  }
 0x307 PF: > { %p766_p2 = scmp.ge.s32.totalorder %s990_s16, 2  ;;  %s587_s11 = sand.u32 1, %s978_s13  }
 0x308   : > { %s588_s22 = scalar_lea.sflag [#allocation4], %s587_s11 }
 0x309   : > { %p754_p3 = pnand %p766_p2, %p1096_p6 }
 0x30b   : > { %p755_p4 = pneg %p754_p3 }
 0x30d   : > { %969 = dma.done.wait (%p755_p4), %s588_s22, 64  }
 0x30e   : > { %971 = vsyncadd (%p755_p4), %s588_s22, 4294967232  ;;  %s598_s17 = scalar_lea.sflag [#allocation11], %s587_s11 }
 0x30f   : > { %973 = dma.done.wait (%p755_p4), %s598_s17, 64  }
 0x310   : > { %975 = vsyncadd (%p755_p4), %s598_s17, 4294967232  ;;  %s1246_s23 = sld [smem:[#allocation17_spill]]  ;;  %p27_p5 = scmp.ge.s32.totalorder %s1079_s19, 4  }
 0x311   : > { %s1247_s13 = smov %s982_s14  ;;  %s1248_s14 = smov %s986_s15 }
 0x312   : > { %s1250_s16 = smov %s1079_s19  ;;  %29 = sbr.rel (!%p27_p5) target bundleno = 13 (0xd), region = 122 }
 0x316   : > { %s1249_s15 = smov %s1246_s23 }
 0x317   :  { %604 = vsyncpa [#allocation3], 1 }
 0x318   :  { %606 = vsyncpa [#allocation3 + $0x1], 1 }
 0x319   :  { %607 = vsyncpa [#allocation8], 1 }
 0x31a   :  { %608 = vsyncpa [#allocation4], 1 }
 0x31b   :  { %610 = vsyncpa [#allocation4 + $0x1], 1 }
 0x31c   :  { %611 = vsyncpa [#allocation11], 1 }
 0x31d   :  { %613 = vsyncpa [#allocation11 + $0x1], 1 }
 0x31e   :  { %614 = vsyncpa [#allocation5], 1 }
 0x31f   :  { %616 = vsyncpa [#allocation5 + $0x1], 1 }

</bundles_post_ra>
